<compile_context>
chip_gen: v5e
topology: v5e:2x2
jax: 0.10.0
libtpu: 0.0.40
codegen_flags: <defaults>
</compile_context>

<pallas_src>
import jax
import jax.numpy as jnp
from jax.experimental import pallas as pl
from jax.experimental.pallas import tpu as pltpu


def _diag_mul_kernel(p_ref, m_ref, o_ref):
    # p_ref: (1, TF), m_ref/o_ref: (TB, TF).  Pure VPU elementwise multiply,
    # P broadcast across the sublane (batch) axis.
    o_ref[...] = (p_ref[...] * m_ref[...]).astype(o_ref.dtype)


def _pick_tile(dim: int, align: int, target: int) -> int:
    """Largest divisor of `dim` that is a multiple of `align` and <= target.

    Falls back to the full dim when `dim` is not a multiple of `align`
    (a full-extent block is always legal; it is just padded/masked).
    """
    if dim % align != 0:
        return dim
    target = max(align, (target // align) * align)
    if dim <= target:
        return dim
    best = align
    for d in range(align, target + 1, align):
        if dim % d == 0:
            best = d
    return best


def diagonal_preconditioner_forward(P, M):
    """P: (C, H, W) diagonal of the preconditioning matrix (per-pixel scale).
    M: (N, C, H, W) input tensor (NCHW, matching the PyTorch module).
    Returns P * M with P broadcast over the batch dimension."""
    N, C, H, W = M.shape
    assert P.shape == (C, H, W)
    F = C * H * W

    out_dtype = jnp.result_type(P.dtype, M.dtype)  # match `P * M` promotion

    m2 = M.reshape(N, F)          # glue reshapes (free in XLA)
    p2 = P.reshape(1, F)

    # Sublane-dense batch tile (multiple of 8 when N allows) and lane-dense
    # feature tile (multiple of 128, bounded so blocks stay ~0.5 MiB).
    TB = _pick_tile(N, 8, 64)
    TF = _pick_tile(F, 128, 16384)
    # TODO(synk): if F is both huge and not a multiple of 128, the full-F
    # fallback block could exceed VMEM; pad F to a multiple of 128 upstream.

    nf = F // TF if F % TF == 0 else pl.cdiv(F, TF)
    nb = N // TB if N % TB == 0 else pl.cdiv(N, TB)

    itemsize_m = jnp.dtype(M.dtype).itemsize
    itemsize_p = jnp.dtype(P.dtype).itemsize
    itemsize_o = jnp.dtype(out_dtype).itemsize
    cost = pl.CostEstimate(
        flops=N * F,
        transcendentals=0,
        bytes_accessed=N * F * (itemsize_m + itemsize_o) + F * itemsize_p,
    )

    grid_spec = pl.GridSpec(
        # Feature blocks outer, batch blocks inner: P's block index (0, f) is
        # constant across consecutive inner steps -> P is DMA'd once per
        # feature tile, not once per (feature, batch) tile.
        grid=(nf, nb),
        in_specs=[
            pl.BlockSpec((1, TF), lambda f, n: (0, f)),    # P (broadcast)
            pl.BlockSpec((TB, TF), lambda f, n: (n, f)),   # M
        ],
        out_specs=pl.BlockSpec((TB, TF), lambda f, n: (n, f)),
    )

    out = pl.pallas_call(
        _diag_mul_kernel,
        out_shape=jax.ShapeDtypeStruct((N, F), out_dtype),
        grid_spec=grid_spec,
        compiler_params=pltpu.CompilerParams(
            dimension_semantics=("parallel", "parallel"),
            vmem_limit_bytes=32 * 1024 * 1024,
        ),
        cost_estimate=cost,
    )(p2, m2)

    return out.reshape(N, C, H, W)


if __name__ == "__main__":
    key = jax.random.PRNGKey(0)
    kP, kM = jax.random.split(key)

    N, C, H, W = 2, 4, 16, 16
    # Deterministic synthetic diagonal _P (positive, as a PSD preconditioner
    # would have) and input M.
    P = jax.random.uniform(kP, (C, H, W), dtype=jnp.float32) + 0.5
    M = jax.random.normal(kM, (N, C, H, W), dtype=jnp.float32)

    out = diagonal_preconditioner_forward(P, M)
    jax.block_until_ready(out)

    # Reference check against plain broadcasting semantics of `self._P * M`.
    ref = P[None] * M
    assert out.shape == (N, C, H, W)
    assert out.dtype == ref.dtype
    assert jnp.allclose(out, ref, atol=1e-6, rtol=1e-6)

    print("KERNEL_OK")
</pallas_src>

<mosaic_0001>
module attributes {stable_mosaic.version = 11 : i64} {
  func.func @_diag_mul_kernel(%arg0: i32, %arg1: i32, %arg2: memref<1x1024xf32, #tpu.memory_space<vmem>>, %arg3: memref<2x1024xf32, #tpu.memory_space<vmem>>, %arg4: memref<2x1024xf32, #tpu.memory_space<vmem>>) attributes {dimension_semantics = [#tpu.dimension_semantics<parallel>, #tpu.dimension_semantics<parallel>], iteration_bounds = array<i64: 1, 1>, scalar_prefetch = 0 : i64, scratch_operands = 0 : i64, tpu.core_type = #tpu.core_type<tc>, window_params = [{transform_indices = @transform_0, window_bounds = array<i64: 1, 1024>}, {transform_indices = @transform_1, window_bounds = array<i64: 2, 1024>}, {transform_indices = @transform_2, window_bounds = array<i64: 2, 1024>}]} {
    %c0 = arith.constant 0 : index
    %c0_0 = arith.constant 0 : index
    %0 = vector.load %arg2[%c0, %c0_0] : memref<1x1024xf32, #tpu.memory_space<vmem>>, vector<1x1024xf32>
    %c0_1 = arith.constant 0 : index
    %c0_2 = arith.constant 0 : index
    %1 = vector.load %arg3[%c0_1, %c0_2] : memref<2x1024xf32, #tpu.memory_space<vmem>>, vector<2x1024xf32>
    %2 = vector.broadcast %0 : vector<1x1024xf32> to vector<2x1024xf32>
    %3 = arith.mulf %2, %1 : vector<2x1024xf32>
    %c0_3 = arith.constant 0 : index
    %c0_4 = arith.constant 0 : index
    %4 = vector.load %arg4[%c0_3, %c0_4] : memref<2x1024xf32, #tpu.memory_space<vmem>>, vector<2x1024xf32>
    tpu.vector_store %arg4[%c0_3, %c0_4], %3 {strides = array<i32>} : memref<2x1024xf32, #tpu.memory_space<vmem>>, vector<2x1024xf32>,
    return
  }
  func.func @transform_0(%arg0: i32, %arg1: i32) -> (i32, i32) {
    %c0_i32 = arith.constant 0 : i32
    %c0_i32_0 = arith.constant 0 : i32
    return %c0_i32, %arg0 : i32, i32
  }
  func.func @transform_1(%arg0: i32, %arg1: i32) -> (i32, i32) {
    %c0_i32 = arith.constant 0 : i32
    return %arg1, %arg0 : i32, i32
  }
  func.func @transform_2(%arg0: i32, %arg1: i32) -> (i32, i32) {
    %c0_i32 = arith.constant 0 : i32
    return %arg1, %arg0 : i32, i32
  }
}

</mosaic_0001>

<bundles_post_ra>
// kernel: tpu_custom_call.1
= control target key start
LH: loop header
LB: loop body
LE: loop exit
PB: predicated region body
PF: predicated region fallthrough
CT: control target
= control target key end

     0   :  { %7 = vsyncpa [#allocation3], 0  ;;  %s248_s0 = inlined_call_operand.hbm [shape: f32[1,1024], index: 0, kind: input, shape index: {}]   ;;  %s249_s1 = inlined_call_operand.hbm [shape: f32[2,1024], index: 1, kind: input, shape index: {}]   ;;  %s250_s2 = inlined_call_operand.hbm [shape: f32[2,1024], index: 2, kind: output, shape index: {}]  }
   0x1   :  { %8 = vsyncpa [#allocation6], 0 }
   0x2   :  { %9 = vsyncpa [#allocation4], 0  ;;  %s15_s11 = sshll.u32 %s248_s0, 4  ;;  %s215_s12 = smov [#allocation2]   ;;  %s16_s11 = int_to_ptr.hbm [resolvable:$true] %s15_s11 }
   0x3   :  { %s17_s13 = sshll.u32 %s215_s12, 4  ;;  %s26_s16 = sshll.u32 %s249_s1, 4  ;;  %s18_s13 = int_to_ptr.vmem [resolvable:$true] %s17_s13  ;;  %s27_s16 = int_to_ptr.hbm [resolvable:$true] %s26_s16 }
   0x4   :  { %20 = dma.hbm_to_vmem [thread:$0]  %s16_s11, 128, %s18_s13, [#allocation3]  }
   0x5   :  { %s216_s17 = smov [#allocation5]  }
   0x6   :  { %s28_s18 = sshll.u32 %s216_s17, 4  ;;  %s29_s18 = int_to_ptr.vmem [resolvable:$true] %s28_s18 }
   0x7   :  { %31 = dma.hbm_to_vmem [thread:$0]  %s27_s16, 256, %s29_s18, [#allocation6]  }
   0x8   :  { %209 = dma.done.wait [#allocation3], 128  }
   0x9   :  { %210 = vsyncadd [#allocation3], 4294967168 }
   0xa   :  { %211 = dma.done.wait [#allocation6], 256  }
   0xb   :  { %212 = vsyncadd [#allocation6], 4294967040  ;;  %v41_v0 = vld [vmem:[#allocation5] sm:$0xff]  ;;  %v42_v1 = vld [vmem:[#allocation5 + $0x8] sm:$0xff]  ;;  %vm103_vm0 = vcmask 1041408   ;;  %vm105_vm1 = vcmask 1045508  }
   0xc   :  { %62 = vst [vmem:[#allocation1] ss:$4 sm:$0xff] %v41_v0  ;;  %v40_v2 = vld [vmem:[#allocation2] sm:$0xff]  ;;  %vm107_vm2 = vcmask 1043456   ;;  %s217_s0 = smov [#allocation7]   ;;  %s123_s21 = sshll.u32 %s250_s2, 4  ;;  %s124_s21 = int_to_ptr.hbm [resolvable:$true] %s123_s21 }
   0xd   :  { %64 = vst [vmem:[#allocation1 + $0x20] ss:$4 sm:$0xff] %v42_v1  ;;  %v45_v3 = vperm.slane %v40_v2, 1  ;;  %v44_v4 = vperm.slane %v40_v2, 0  ;;  %v46_v5 = vperm.slane %v40_v2, 2  ;;  %v47_v6 = vperm.slane %v40_v2, 3 }
   0xe   :  { %v48_v7 = vperm.slane %v40_v2, 4  ;;  %v49_v8 = vperm.slane %v40_v2, 5  ;;  %v50_v9 = vperm.slane %v40_v2, 6  ;;  %v51_v10 = vperm.slane %v40_v2, 7  ;;  %s121_s1 = sshll.u32 %s217_s0, 4  ;;  %s122_s1 = int_to_ptr.vmem [resolvable:$true] %s121_s1 }
  0x13   :  { %v65_v11 = vld.sshfl [vmem:[#allocation1] sm:$0xff pattern:$0x73625140]  ;;  %v66_v12 = vld.sshfl [vmem:[#allocation1 + $0x8] sm:$0xff pattern:$0x73625140] }
  0x14   :  { %v67_v13 = vld.sshfl [vmem:[#allocation1 + $0x10] sm:$0xff pattern:$0x73625140]  ;;  %v68_v14 = vld.sshfl [vmem:[#allocation1 + $0x18] sm:$0xff pattern:$0x73625140]  ;;  %v82_v15 = vmul.f32 %v66_v12, %v45_v3  ;;  %v81_v20 = vmul.f32 %v65_v11, %v44_v4 }
  0x15   :  { %v83_v16 = vmul.f32 %v67_v13, %v46_v5  ;;  %v84_v17 = vmul.f32 %v68_v14, %v47_v6  ;;  %v69_v18 = vld.sshfl [vmem:[#allocation1 + $0x20] sm:$0xff pattern:$0x73625140]  ;;  %v70_v19 = vld.sshfl [vmem:[#allocation1 + $0x28] sm:$0xff pattern:$0x73625140] }
  0x16   :  { %v97_v21 = vrot.slane %v82_v15, 6  ;;  %v71_v22 = vld.sshfl [vmem:[#allocation1 + $0x30] sm:$0xff pattern:$0x73625140]  ;;  %v86_v23 = vmul.f32 %v70_v19, %v49_v8  ;;  %v85_v29 = vmul.f32 %v69_v18, %v48_v7 }
  0x17   :  { %v98_v24 = vrot.slane %v83_v16, 4  ;;  %v99_v25 = vrot.slane %v84_v17, 2  ;;  %v72_v26 = vld.sshfl [vmem:[#allocation1 + $0x38] sm:$0xff pattern:$0x73625140]  ;;  %v87_v27 = vmul.f32 %v71_v22, %v50_v9 }
  0x18   :  { %v104_v28 = vsel %vm103_vm0, %v81_v20, %v97_v21  ;;  %v88_v30 = vmul.f32 %v72_v26, %v51_v10  ;;  %v100_v31 = vrot.slane %v86_v23, 6 }
  0x19   :  { %v106_v32 = vsel %vm105_vm1, %v98_v24, %v99_v25  ;;  %v101_v33 = vrot.slane %v87_v27, 4 }
  0x1a   :  { %v108_v34 = vsel %vm107_vm2, %v104_v28, %v106_v32  ;;  %v102_v35 = vrot.slane %v88_v30, 2  ;;  %v109_v36 = vsel %vm103_vm0, %v85_v29, %v100_v31 }
  0x1b   :  { %114 = vst [vmem:[#allocation7] sm:$0xff] %v108_v34 }
  0x1c   :  { %v110_v37 = vsel %vm105_vm1, %v101_v33, %v102_v35 }
  0x1d   :  { %v111_v38 = vsel %vm107_vm2, %v109_v36, %v110_v37 }
  0x1e   :  { %115 = vst [vmem:[#allocation7 + $0x8] sm:$0xff] %v111_v38 }
  0x1f   :  { %126 = dma.vmem_to_hbm [thread:$0]  %s122_s1, 256, %s124_s21, [#allocation4]  }
  0x20   :  { %213 = dma.done.wait [#allocation4], 256  }
  0x21   :  { %214 = vsyncadd [#allocation4], 4294967040 }
  0x22   :  { %131 = vsyncpa [#allocation3], 1 }
  0x23   :  { %132 = vsyncpa [#allocation6], 1 }
  0x24   :  { %133 = vsyncpa [#allocation4], 1 }

</bundles_post_ra>
